<compile_context>
chip_gen: v7x
topology: tpu7x:2x2x1
jax: 0.10.0
libtpu: 0.0.40
codegen_flags: <defaults>
</compile_context>

<pallas_src>
import functools

import jax
import jax.numpy as jnp
from jax import lax
from jax.experimental import pallas as pl
from jax.experimental.pallas import tpu as pltpu


def lastblock_kernel(x_ref, w_ref, gamma_ref, beta_ref, o_ref, *, inv_n, eps):
    # MXU matmul: bf16 operands, f32 accumulation. Scale already folded into w.
    x = x_ref[...].astype(jnp.bfloat16)                       # (N, C_in)
    w = w_ref[...]                                            # (C_in, TILE_CO) bf16
    y = jnp.dot(x, w, preferred_element_type=jnp.float32)     # (N, TILE_CO) f32

    # Single-pass per-channel batch statistics over N (the two reductions co-issue).
    s1 = jnp.sum(y, axis=0, keepdims=True)                    # (1, TILE_CO)
    s2 = jnp.sum(y * y, axis=0, keepdims=True)                # (1, TILE_CO)
    mean = s1 * inv_n
    var = s2 * inv_n - mean * mean                            # biased variance (training BN)
    inv_std = lax.rsqrt(var + eps)

    # Fuse the BN affine into one mul+add pass over the (N, TILE_CO) tile.
    a = gamma_ref[...].astype(jnp.float32) * inv_std          # (1, TILE_CO)
    b = beta_ref[...].astype(jnp.float32) - mean * a          # (1, TILE_CO)
    o_ref[...] = (y * a + b).astype(o_ref.dtype)


def _pick_tile_co(c_out):
    # Largest lane-dense tile (multiple of 128) that divides C_out; otherwise
    # fall back to the full extent (valid under the full-array exemption).
    for t in (512, 256, 128):
        if c_out % t == 0:
            return t
    return c_out


def last_block(x, w_kernel, gamma, beta, *, eps=1e-5):
    """x: (N, C_in); w_kernel: (C_in, C_out) bf16 with scale pre-folded;
    gamma/beta: (1, C_out) f32.  Returns (N, C_out) f32."""
    n, c_in = x.shape
    c_out = w_kernel.shape[1]
    tile_co = _pick_tile_co(c_out)
    grid = (c_out // tile_co,)

    kernel = functools.partial(lastblock_kernel, inv_n=1.0 / n, eps=float(eps))

    bytes_accessed = (
        x.size * x.dtype.itemsize
        + w_kernel.size * w_kernel.dtype.itemsize
        + gamma.size * gamma.dtype.itemsize
        + beta.size * beta.dtype.itemsize
        + n * c_out * 4  # f32 output
    )
    cost = pl.CostEstimate(
        flops=2 * n * c_in * c_out,
        transcendentals=0,
        bytes_accessed=bytes_accessed,
    )

    vmem = pltpu.MemorySpace.VMEM
    return pl.pallas_call(
        kernel,
        out_shape=jax.ShapeDtypeStruct((n, c_out), jnp.float32),
        grid=grid,
        in_specs=[
            pl.BlockSpec((n, c_in), lambda j: (0, 0), memory_space=vmem),       # x resident
            pl.BlockSpec((c_in, tile_co), lambda j: (0, j), memory_space=vmem),  # weight stream
            pl.BlockSpec((1, tile_co), lambda j: (0, j), memory_space=vmem),
            pl.BlockSpec((1, tile_co), lambda j: (0, j), memory_space=vmem),
        ],
        out_specs=pl.BlockSpec((n, tile_co), lambda j: (0, j), memory_space=vmem),
        compiler_params=pltpu.CompilerParams(
            dimension_semantics=("parallel",),
        ),
        cost_estimate=cost,
    )(x, w_kernel, gamma, beta)


def last_block_ref(x, w_kernel, gamma, beta, *, eps=1e-5):
    # Pure-JAX reference (two-pass variance, unfused affine).
    y = jnp.dot(x, w_kernel, preferred_element_type=jnp.float32)
    mean = jnp.mean(y, axis=0, keepdims=True)
    var = jnp.mean((y - mean) ** 2, axis=0, keepdims=True)
    return (y - mean) / jnp.sqrt(var + eps) * gamma + beta


if __name__ == "__main__":
    # Shapes consistent with the module: batch=8, in_channels=64, out_channels=128.
    N, C_IN, C_OUT = 8, 64, 128
    key = jax.random.PRNGKey(0)
    kx, kw = jax.random.split(key)

    x = jax.random.normal(kx, (N, C_IN), dtype=jnp.float32)

    # nn.Linear(C_IN, C_OUT, bias=False) weight in PyTorch (out, in) layout.
    weight = jax.random.normal(kw, (C_OUT, C_IN), dtype=jnp.float32) * 0.05
    gamma = jnp.ones((1, C_OUT), dtype=jnp.float32)    # bn.weight (frozen, init 1)
    beta = jnp.zeros((1, C_OUT), dtype=jnp.float32)    # bn.bias  (init 0)

    scale = 1.0 / (C_IN ** 0.5)                        # wscale_gain / sqrt(in_channels)

    # One-time parameter prep: fold scale into the weight, transpose to
    # (C_in, C_out), cast to bf16 for the MXU.
    w_kernel = (weight.T * scale).astype(jnp.bfloat16)

    out = jax.block_until_ready(last_block(x, w_kernel, gamma, beta))

    # Reference 1: identical bf16 matmul precision (checks kernel mechanics).
    ref_bf16 = last_block_ref(x.astype(jnp.bfloat16), w_kernel, gamma, beta)
    # Reference 2: full-f32 module semantics (loose tolerance for bf16 operands).
    ref_f32 = last_block_ref(x, weight.T.astype(jnp.float32) * scale, gamma, beta)

    assert out.shape == (N, C_OUT)
    assert jnp.allclose(out, ref_bf16, atol=2e-3, rtol=2e-3), "mismatch vs bf16 reference"
    assert jnp.allclose(out, ref_f32, atol=5e-2, rtol=5e-2), "mismatch vs f32 reference"

    print("KERNEL_OK")
</pallas_src>

<mosaic_0001>
module attributes {stable_mosaic.version = 11 : i64} {
  func.func @lastblock_kernel(%arg0: i32, %arg1: memref<8x64xf32, #tpu.memory_space<vmem>>, %arg2: memref<64x128xbf16, #tpu.memory_space<vmem>>, %arg3: memref<1x128xf32, #tpu.memory_space<vmem>>, %arg4: memref<1x128xf32, #tpu.memory_space<vmem>>, %arg5: memref<8x128xf32, #tpu.memory_space<vmem>>) attributes {dimension_semantics = [#tpu.dimension_semantics<parallel>], iteration_bounds = array<i64: 1>, scalar_prefetch = 0 : i64, scratch_operands = 0 : i64, tpu.core_type = #tpu.core_type<tc>, window_params = [{pipeline_mode = #tpu.pipeline_mode<synchronous>, transform_indices = @transform_0, window_bounds = array<i64: 8, 64>}, {transform_indices = @transform_1, window_bounds = array<i64: 64, 128>}, {transform_indices = @transform_2, window_bounds = array<i64: 1, 128>}, {transform_indices = @transform_3, window_bounds = array<i64: 1, 128>}, {transform_indices = @transform_4, window_bounds = array<i64: 8, 128>}]} {
    %c0 = arith.constant 0 : index
    %c0_0 = arith.constant 0 : index
    %0 = vector.load %arg1[%c0, %c0_0] : memref<8x64xf32, #tpu.memory_space<vmem>>, vector<8x64xf32>
    %1 = arith.truncf %0 : vector<8x64xf32> to vector<8x64xbf16>
    %c0_1 = arith.constant 0 : index
    %c0_2 = arith.constant 0 : index
    %2 = vector.load %arg2[%c0_1, %c0_2] : memref<64x128xbf16, #tpu.memory_space<vmem>>, vector<64x128xbf16>
    %cst = arith.constant dense<0.000000e+00> : vector<8x128xf32>
    %3 = tpu.matmul %1, %2, %cst {dimension_numbers = #tpu.dot_dimension_numbers<[1], [0], [0], [1], [0, 0, 1, 1], [], []>} : vector<8x64xbf16>, vector<64x128xbf16>, vector<8x128xf32> -> vector<8x128xf32>
    %cst_3 = arith.constant dense<0.000000e+00> : vector<128xf32>
    %4 = vector.multi_reduction <add>, %3, %cst_3 [0] : vector<8x128xf32> to vector<128xf32>
    %5 = vector.shape_cast %4 : vector<128xf32> to vector<1x128xf32>
    %6 = arith.mulf %3, %3 : vector<8x128xf32>
    %cst_4 = arith.constant dense<0.000000e+00> : vector<128xf32>
    %7 = vector.multi_reduction <add>, %6, %cst_4 [0] : vector<8x128xf32> to vector<128xf32>
    %8 = vector.shape_cast %7 : vector<128xf32> to vector<1x128xf32>
    %cst_5 = arith.constant 1.250000e-01 : f32
    %9 = vector.broadcast %cst_5 : f32 to vector<1x128xf32>
    %10 = arith.mulf %5, %9 : vector<1x128xf32>
    %cst_6 = arith.constant 1.250000e-01 : f32
    %11 = vector.broadcast %cst_6 : f32 to vector<1x128xf32>
    %12 = arith.mulf %8, %11 : vector<1x128xf32>
    %13 = arith.mulf %10, %10 : vector<1x128xf32>
    %14 = arith.subf %12, %13 : vector<1x128xf32>
    %cst_7 = arith.constant 9.99999974E-6 : f32
    %15 = vector.broadcast %cst_7 : f32 to vector<1x128xf32>
    %16 = arith.addf %14, %15 : vector<1x128xf32>
    %17 = math.rsqrt %16 : vector<1x128xf32>
    %c0_8 = arith.constant 0 : index
    %c0_9 = arith.constant 0 : index
    %18 = vector.load %arg3[%c0_8, %c0_9] : memref<1x128xf32, #tpu.memory_space<vmem>>, vector<1x128xf32>
    %19 = arith.mulf %18, %17 : vector<1x128xf32>
    %c0_10 = arith.constant 0 : index
    %c0_11 = arith.constant 0 : index
    %20 = vector.load %arg4[%c0_10, %c0_11] : memref<1x128xf32, #tpu.memory_space<vmem>>, vector<1x128xf32>
    %21 = arith.mulf %10, %19 : vector<1x128xf32>
    %22 = arith.subf %20, %21 : vector<1x128xf32>
    %23 = vector.broadcast %19 : vector<1x128xf32> to vector<8x128xf32>
    %24 = arith.mulf %3, %23 : vector<8x128xf32>
    %25 = vector.broadcast %22 : vector<1x128xf32> to vector<8x128xf32>
    %26 = arith.addf %24, %25 : vector<8x128xf32>
    %c0_12 = arith.constant 0 : index
    %c0_13 = arith.constant 0 : index
    %27 = vector.load %arg5[%c0_12, %c0_13] : memref<8x128xf32, #tpu.memory_space<vmem>>, vector<8x128xf32>
    tpu.vector_store %arg5[%c0_12, %c0_13], %26 {strides = array<i32>} : memref<8x128xf32, #tpu.memory_space<vmem>>, vector<8x128xf32>,
    return
  }
  func.func @transform_0(%arg0: i32) -> (i32, i32) {
    %c0_i32 = arith.constant 0 : i32
    %c0_i32_0 = arith.constant 0 : i32
    %c0_i32_1 = arith.constant 0 : i32
    return %c0_i32, %c0_i32_0 : i32, i32
  }
  func.func @transform_1(%arg0: i32) -> (i32, i32) {
    %c0_i32 = arith.constant 0 : i32
    %c0_i32_0 = arith.constant 0 : i32
    return %c0_i32, %arg0 : i32, i32
  }
  func.func @transform_2(%arg0: i32) -> (i32, i32) {
    %c0_i32 = arith.constant 0 : i32
    %c0_i32_0 = arith.constant 0 : i32
    return %c0_i32, %arg0 : i32, i32
  }
  func.func @transform_3(%arg0: i32) -> (i32, i32) {
    %c0_i32 = arith.constant 0 : i32
    %c0_i32_0 = arith.constant 0 : i32
    return %c0_i32, %arg0 : i32, i32
  }
  func.func @transform_4(%arg0: i32) -> (i32, i32) {
    %c0_i32 = arith.constant 0 : i32
    %c0_i32_0 = arith.constant 0 : i32
    return %c0_i32, %arg0 : i32, i32
  }
}

</mosaic_0001>

<bundles_post_ra>
// kernel: tpu_custom_call.1
= control target key start
LH: loop header
LB: loop body
LE: loop exit
PB: predicated region body
PF: predicated region fallthrough
CT: control target
= control target key end

     0   :  { %9 = vsyncpa [#allocation3], 0  ;;  %s366_s0 = inlined_call_operand.hbm [shape: f32[8,64], index: 0, kind: input, shape index: {}]   ;;  %s367_s1 = inlined_call_operand.hbm [shape: bf16[64,128], index: 1, kind: input, shape index: {}]   ;;  %s368_s2 = inlined_call_operand.vmem [shape: f32[1,128], index: 2, kind: input, shape index: {}]   ;;  %s369_s3 = inlined_call_operand.vmem [shape: f32[1,128], index: 3, kind: input, shape index: {}]   ;;  %s370_s4 = inlined_call_operand.hbm [shape: f32[8,128], index: 4, kind: output, shape index: {}]  }
   0x1   :  { %10 = vsyncpa [#allocation6], 0 }
   0x2   :  { %11 = vsyncpa [#allocation4], 0  ;;  %s285_s15 = smov [#allocation2]   ;;  %s286_s17 = smov [#allocation5]  }
   0x3   :  { %s18_s16 = sshll.u32 %s285_s15, 4  ;;  %s27_s18 = sshll.u32 %s286_s17, 4  ;;  %s19_s16 = int_to_ptr.vmem [resolvable:$true] %s18_s16  ;;  %s317_s18 = int_to_ptr.vmem [resolvable:$true] %s27_s18 }
   0x4   :  { %s213_s21 = scalar_lea.hbm %s366_s0, 128 }
   0x5   :  { %p214_p0 = scmp.ne.s32.totalorder %s366_s0, %s213_s21  ;;  %p217_p1 = scmp.lt.u32.totalorder %s213_s21, %s366_s0 }
   0x7   :  { %p219_p2 = pnand %p217_p1, %p214_p0 }
   0x9   :  { %222 = shalt.err (!%p219_p2)
}
   0xa   :  { %s223_s26 = scalar_lea.vmem %s19_s16, 128  ;;  %p228_p4 = scmp.lt.s32.totalorder %s19_s16, %s19_s16 }
   0xb   :  { %p224_p3 = scmp.ne.s32.totalorder %s19_s16, %s223_s26  ;;  %p229_p5 = scmp.lt.s32.totalorder %s223_s26, %s223_s26 }
   0xd   :  { %p230_p6 = por %p229_p5, %p228_p4 }
   0xf   :  { %p231_p7 = pnand %p230_p6, %p224_p3 }
  0x11   :  { %234 = shalt.err (!%p231_p7)
}
  0x12   :  { %21 = dma.hbm_to_vmem [thread:$0]  %s366_s0, 128, %s19_s16, [#allocation3]  }
  0x13   :  { %s235_s5 = scalar_lea.hbm %s367_s1, 512 }
  0x14   :  { %p236_p8 = scmp.ne.s32.totalorder %s367_s1, %s235_s5  ;;  %p239_p9 = scmp.lt.u32.totalorder %s235_s5, %s367_s1 }
  0x16   :  { %p241_p10 = pnand %p239_p9, %p236_p8 }
  0x18   :  { %244 = shalt.err (!%p241_p10)
}
  0x19   :  { %s245_s10 = scalar_lea.vmem %s317_s18, 512  ;;  %p250_p12 = scmp.lt.s32.totalorder %s317_s18, %s317_s18 }
  0x1a   :  { %p246_p11 = scmp.ne.s32.totalorder %s317_s18, %s245_s10  ;;  %p251_p13 = scmp.lt.s32.totalorder %s245_s10, %s245_s10 }
  0x1c   :  { %p252_p0 = por %p251_p13, %p250_p12 }
  0x1e   :  { %p253_p1 = pnand %p252_p0, %p246_p11 }
  0x20   :  { %256 = shalt.err (!%p253_p1)
}
  0x21   :  { %s287_s0 = smov 64   ;;  %s288_s11 = smov 4  }
  0x22   :  { %33 = dma.hbm_to_vmem [thread:$0]  %s367_s1, 512, %s317_s18, [#allocation6], %s287_s0, %s287_s0, %s288_s11  }
  0x23   :  { %279 = dma.done.wait [#allocation3], 128  }
  0x24   :  { %280 = vsyncadd [#allocation3], 4294967168 }
  0x25   :  { %281 = dma.done.wait [#allocation6], 512  }
  0x26   :  { %282 = vsyncadd [#allocation6], 4294966784  ;;  %v289_v0 = vmov 0.0   ;;  %vm290_vm0 = vmmov 0   ;;  %v207_v1 = vld [vmem:[#allocation5] sm:$0xff]   ;;  %v208_v2 = vld [vmem:[#allocation5 + $0x8] sm:$0xff]   ;;  %v148_v29 = vlaneseq }
  0x27   :  { %188 = vmatprep.subr.bf16.mxu0 %v289_v0  ;;  %196 = vmatprep.mubr.msk.bf16.mxu0 %vm290_vm0, %v289_v0  ;;  %v209_v3 = vld [vmem:[#allocation5 + $0x10] sm:$0xff]   ;;  %v210_v4 = vld [vmem:[#allocation5 + $0x18] sm:$0xff]   ;;  %vm79_vm1 = vcmask 523264   ;;  %s291_s17 = smov [#allocation7]  }
  0x28   :  { %189 = vmatpush3.bf16.msra.mxu0 %v207_v1  ;;  %v45_v5 = vld [vmem:[#allocation2] sm:$0xff]  ;;  %v149_v30 = vshrl.u32 %v148_v29, 7  ;;  %s168_s18 = sshll.u32 %s291_s17, 4  ;;  %s169_s18 = int_to_ptr.vmem [resolvable:$true] %s168_s18 }
  0x29   :  { %190 = vmatprep.subr.bf16.mxu0 %v289_v0  ;;  %v46_v6 = vpack.c.bf16 %v45_v5, %v45_v5  ;;  %v142_v31 = vld [vmem:[%s368_s2] sm:$0x1]  ;;  %s257_s19 = scalar_lea.vmem %s169_s18, 128  ;;  %p262_p3 = scmp.lt.s32.totalorder %s169_s18, %s169_s18 }
  0x2a   :  { %v150_v32 = vsub.s32 0, %v149_v30  ;;  %v144_v35 = vld [vmem:[%s369_s3] sm:$0x1]  ;;  %p258_p2 = scmp.ne.s32.totalorder %s169_s18, %s257_s19  ;;  %p263_p4 = scmp.lt.s32.totalorder %s257_s19, %s257_s19 }
  0x2c   :  { %191 = vmatpush3.bf16.msra.mxu0 %v208_v2  ;;  %p264_p5 = por %p263_p4, %p262_p3 }
  0x2d   :  { %192 = vmatprep.subr.bf16.mxu0 %v289_v0 }
  0x2e   :  { %p265_p6 = pnand %p264_p5, %p258_p2 }
  0x30   :  { %193 = vmatpush3.bf16.msra.mxu0 %v209_v3 }
  0x31   :  { %194 = vmatprep.subr.bf16.mxu0 %v289_v0 }
  0x34   :  { %195 = vmatpush3.bf16.msra.mxu0 %v210_v4 }
  0x37   :  { %197 = vmatmul.mubr.msk.bf16.vlgmr.msra.gmra.mrb[0].mxu0 %vm79_vm1, %v46_v6 }
 0x10a   :  { %v117_v7 = vpop.f32.mrb[0].mxu0 }
 0x10b   :  { %v123_v8 = vrot.slane %v117_v7, 4  ;;  %v129_v9 = vmul.f32 %v117_v7, %v117_v7  ;;  %v198_v10 = vpop.f32.mrb[1].mxu0 }
 0x10c   :  { %v120_v11 = vpop.f32.mrb[2].mxu0 }
 0x10d   :  { %v124_v12 = vadd.f32 %v123_v8, %v117_v7  ;;  %v130_v13 = vrot.slane %v129_v9, 4  ;;  %v199_v14 = vpop.f32.mrb[3].mxu0 }
 0x10f   :  { %v125_v15 = vrot.slane %v124_v12, 2  ;;  %v131_v16 = vadd.f32 %v130_v13, %v129_v9 }
 0x111   :  { %v126_v17 = vadd.f32 %v125_v15, %v124_v12  ;;  %v132_v18 = vrot.slane %v131_v16, 2 }
 0x113   :  { %v127_v19 = vrot.slane %v126_v17, 1  ;;  %v133_v20 = vadd.f32 %v132_v18, %v131_v16 }
 0x115   :  { %v128_v21 = vadd.f32 %v127_v19, %v126_v17  ;;  %v134_v22 = vrot.slane %v133_v20, 1 }
 0x117   :  { %v135_v23 = vadd.f32 %v134_v22, %v133_v20  ;;  %v136_v24 = vmul.f32 0.125, %v128_v21 }
 0x119   :  { %v137_v25 = vmul.f32 0.125, %v135_v23  ;;  %v138_v26 = vmul.f32 %v136_v24, %v136_v24 }
 0x11b   :  { %v139_v27 = vsub.f32 %v137_v25, %v138_v26 }
 0x11d   :  { %v140_v28 = vadd.f32 1e-05, %v139_v27 }
 0x11f   :  { %211 = vrsqrt.f32 %v140_v28 }
 0x129   :  { %v212_v33 = vpop.eup %211 }
 0x12a   :  { %v143_v34 = vmul.f32 %v212_v33, %v142_v31 }
 0x12c   :  { %v145_v36 = vmul.f32 %v143_v34, %v136_v24  ;;  %v151_v37 = vrot.slane %v143_v34, %v150_v32 }
 0x12e   :  { %v146_v38 = vsub.f32 %v144_v35, %v145_v36  ;;  %v153_v39 = vmul.f32 %v151_v37, %v117_v7 }
 0x130   :  { %v158_v40 = vrot.slane %v146_v38, %v150_v32 }
 0x132   :  { %v160_v41 = vadd.f32 %v158_v40, %v153_v39 }
 0x134   :  { %161 = vst [vmem:[#allocation7] sm:$0xff] %v160_v41 }
 0x135   :  { %268 = shalt.err (!%p265_p6)
}
 0x136   :  { %s269_s3 = scalar_lea.hbm %s370_s4, 128 }
 0x137   :  { %p270_p7 = scmp.ne.s32.totalorder %s370_s4, %s269_s3  ;;  %p273_p8 = scmp.lt.u32.totalorder %s269_s3, %s370_s4 }
 0x139   :  { %p275_p9 = pnand %p273_p8, %p270_p7 }
 0x13b   :  { %278 = shalt.err (!%p275_p9)
}
 0x13c   :  { %171 = dma.vmem_to_hbm [thread:$0]  %s169_s18, 128, %s370_s4, [#allocation4]  }
 0x13d   :  { %283 = dma.done.wait [#allocation4], 128  }
 0x13e   :  { %284 = vsyncadd [#allocation4], 4294967168 }
 0x13f   :  { %175 = vsyncpa [#allocation3], 1 }
 0x140   :  { %176 = vsyncpa [#allocation6], 1 }
 0x141   :  { %177 = vsyncpa [#allocation4], 1 }

</bundles_post_ra>
